<compile_context>
chip_gen: v7x
topology: tpu7x:2x2x1
jax: 0.10.0
libtpu: 0.0.40
codegen_flags: <defaults>
</compile_context>

<pallas_src>
import functools
import inspect
import math

import jax
import jax.numpy as jnp
from jax.experimental import pallas as pl
from jax.experimental.pallas import tpu as pltpu


# ----------------------------------------------------------------------------
# Small helpers
# ----------------------------------------------------------------------------
def _round_up(x, m):
    return ((x + m - 1) // m) * m


def _pad2d(a, rows, cols):
    r, c = a.shape
    if r == rows and c == cols:
        return a
    return jnp.pad(a, ((0, rows - r), (0, cols - c)))


def _vmem_capacity_bytes():
    """Physical VMEM per TensorCore (v5e/v6e: 128 MiB, v7x: 64 MiB)."""
    try:
        cap = getattr(pltpu.get_tpu_info(), "vmem_capacity_bytes", None)
        if cap:
            return int(cap)
    except Exception:
        pass
    return 64 * 2**20  # conservative (v7x-sized) fallback


try:
    _HAS_PIPELINE_MODE = hasattr(pl, "Buffered") and (
        "pipeline_mode" in inspect.signature(pl.BlockSpec).parameters
    )
except (TypeError, ValueError):  # pragma: no cover - defensive
    _HAS_PIPELINE_MODE = False


# ----------------------------------------------------------------------------
# Streamed kernel:  out = [relu](adj_rows @ t)   (t = h @ w hoisted outside)
# ----------------------------------------------------------------------------
def _adj_t_kernel(adj_ref, t_ref, o_ref, *, apply_relu):
    r = jnp.dot(adj_ref[...], t_ref[...], preferred_element_type=jnp.float32)
    if apply_relu:
        r = jnp.maximum(r, 0.0)
    o_ref[...] = r.astype(o_ref.dtype)


def _adj_t_matmul(adj_p, t_p, *, relu, out_dtype, tm, buf_depth, vmem_limit):
    mp, kp = adj_p.shape
    kp2, fp = t_p.shape
    assert kp == kp2 and mp % tm == 0
    grid_rows = mp // tm

    adj_kwargs = {}
    if _HAS_PIPELINE_MODE and buf_depth > 2 and grid_rows >= buf_depth:
        adj_kwargs["pipeline_mode"] = pl.Buffered(buf_depth)

    kernel = functools.partial(_adj_t_kernel, apply_relu=relu)
    return pl.pallas_call(
        kernel,
        out_shape=jax.ShapeDtypeStruct((mp, fp), out_dtype),
        grid_spec=pltpu.PrefetchScalarGridSpec(
            num_scalar_prefetch=0,
            grid=(grid_rows,),
            in_specs=[
                # adj row tiles: the HBM-bound stream, full K width.
                pl.BlockSpec((tm, kp), lambda i: (i, 0), **adj_kwargs),
                # t = h @ w: tiny resident operand, constant block index.
                pl.BlockSpec((kp, fp), lambda i: (0, 0)),
            ],
            out_specs=pl.BlockSpec((tm, fp), lambda i: (i, 0)),
        ),
        compiler_params=pltpu.CompilerParams(
            # No cross-iteration state -> row tiles shard across TensorCores.
            dimension_semantics=("parallel",),
            vmem_limit_bytes=int(vmem_limit),
        ),
    )(adj_p, t_p)


def _choose_row_tile(kp, fmax, budget):
    """Pick (row_tile, adj buffer depth) that fit the VMEM budget."""
    resident = 2 * kp * fmax * 2          # double-buffered resident t (bf16)
    candidates = [t for t in (1024, 512, 256, 128) if t <= kp] or [128]
    for tm in candidates:
        for depth in (3, 2):
            need = depth * tm * kp * 2 + resident + 2 * tm * fmax * 4
            if need <= int(0.85 * budget):
                return tm, depth
    return 128, 2


# ----------------------------------------------------------------------------
# Fused whole-forward kernel: adj resident in VMEM, all layers in one call
# ----------------------------------------------------------------------------
def _fused_forward_kernel(*refs, first_relu):
    adj_ref, t_ref = refs[0], refs[1]
    w_refs = refs[2:-1]
    o_ref = refs[-1]

    adj = adj_ref[...]                                      # bf16, resident
    h = jnp.dot(adj, t_ref[...], preferred_element_type=jnp.float32)
    if first_relu:
        h = jnp.maximum(h, 0.0)
    for idx, w_ref in enumerate(w_refs):
        t = jnp.dot(h.astype(w_ref.dtype), w_ref[...],
                    preferred_element_type=jnp.float32)
        h = jnp.dot(adj, t.astype(adj.dtype),
                    preferred_element_type=jnp.float32)
        if idx < len(w_refs) - 1:
            h = jnp.maximum(h, 0.0)
    o_ref[...] = h.astype(o_ref.dtype)


def _fused_forward(adj_p, t1_p, rest_ws, *, first_relu, out_cols, vmem_limit):
    mp = adj_p.shape[0]
    kernel = functools.partial(_fused_forward_kernel, first_relu=first_relu)
    return pl.pallas_call(
        kernel,
        out_shape=jax.ShapeDtypeStruct((mp, out_cols), jnp.float32),
        compiler_params=pltpu.CompilerParams(vmem_limit_bytes=int(vmem_limit)),
    )(adj_p, t1_p, *rest_ws)


# ----------------------------------------------------------------------------
# Metattack.forward : GCN surrogate forward pass
# ----------------------------------------------------------------------------
def metattack_forward(adj, x, weights, *, compute_dtype=jnp.bfloat16,
                      force_streamed=False):
    """h = x; for w in weights[:-1]: h = relu(adj @ (h @ w));
    return adj @ (h @ weights[-1])."""
    n = adj.shape[0]
    n_cls = weights[-1].shape[1]
    kp = _round_up(n, 128)
    fin_p = _round_up(x.shape[1], 128)
    w_pads = [(_round_up(w.shape[0], 128), _round_up(w.shape[1], 128))
              for w in weights]

    capacity = _vmem_capacity_bytes()
    budget = max(int(0.8 * capacity), 32 * 2**20)

    # --- fused path: adj resident in VMEM, all layers in a single kernel ----
    hmax = max(b for _, b in w_pads)
    fused_need = (
        kp * kp * 2                                   # resident adj (bf16)
        + kp * w_pads[0][1] * 2                       # t1 (bf16)
        + sum(a * b * 2 for a, b in w_pads[1:])       # resident weights (bf16)
        + kp * w_pads[-1][1] * 4                      # f32 output
        + 3 * kp * hmax * 4                           # intermediate headroom
    )
    use_fused = (not force_streamed) and fused_need <= int(0.5 * capacity)

    if use_fused:
        adj_p = _pad2d(adj, kp, kp).astype(compute_dtype)
        x_p = _pad2d(x, kp, fin_p).astype(jnp.float32)
        w0_p = _pad2d(weights[0], fin_p, w_pads[0][1]).astype(jnp.float32)
        # t1 = x @ w1 is tiny; hoisted out of the kernel (plain XLA dot).
        t1 = jnp.dot(x_p, w0_p,
                     preferred_element_type=jnp.float32).astype(compute_dtype)
        rest_ws = [
            _pad2d(w, a, b).astype(compute_dtype)
            for w, (a, b) in zip(weights[1:], w_pads[1:])
        ]
        vmem_limit = min(budget, max(32 * 2**20, int(1.3 * fused_need)))
        out_p = _fused_forward(adj_p, t1, rest_ws,
                               first_relu=len(weights) > 1,
                               out_cols=w_pads[-1][1], vmem_limit=vmem_limit)
        return out_p[:n, :n_cls]

    # --- streamed path: one (adj @ t) kernel per layer -----------------------
    fmax = max(b for _, b in w_pads)
    tm, depth = _choose_row_tile(kp, fmax, budget)
    mp = _round_up(n, tm)              # pad rows only up to the row tile
    adj_p = _pad2d(adj, mp, kp).astype(compute_dtype)

    h = _pad2d(x, kp, fin_p).astype(jnp.float32)
    out_p = None
    for li, (w, (a, b)) in enumerate(zip(weights, w_pads)):
        is_last = li == len(weights) - 1
        w_p = _pad2d(w, a, b).astype(jnp.float32)
        # Hoisted t = h @ w (tiny), bf16 for the HBM-bound streaming matmul.
        t = jnp.dot(h, w_p,
                    preferred_element_type=jnp.float32).astype(compute_dtype)
        out_dtype = jnp.float32 if is_last else compute_dtype
        out_p = _adj_t_matmul(adj_p, t, relu=not is_last, out_dtype=out_dtype,
                              tm=tm, buf_depth=depth, vmem_limit=budget)
        h = out_p[:kp]                 # mp >= kp; padded rows are exact zeros
    return out_p[:n, :n_cls]


# ----------------------------------------------------------------------------
# Module glue: dense_gcn_norm and weight init (mimics reset())
# ----------------------------------------------------------------------------
def dense_gcn_norm(adj):
    """Metattack.dense_gcn_norm: D^{-1/2} (A + I) D^{-1/2} (JAX glue)."""
    n = adj.shape[0]
    mx = adj + jnp.eye(n, dtype=adj.dtype)
    rowsum = mx.sum(1)
    r_inv = jnp.power(rowsum, -0.5)
    r_inv = jnp.where(jnp.isinf(r_inv), 0.0, r_inv)
    return mx * r_inv[:, None] * r_inv[None, :]


def make_weights(key, dims):
    """Weights as in Metattack.reset(): uniform(-stdv, stdv), stdv=1/sqrt(fan_out)."""
    weights = []
    for d_in, d_out in zip(dims[:-1], dims[1:]):
        key, sub = jax.random.split(key)
        stdv = 1.0 / math.sqrt(d_out)
        w = jax.random.uniform(
            sub, (d_in, d_out), minval=-stdv, maxval=stdv, dtype=jnp.float32
        )
        weights.append(w)
    return weights


# ----------------------------------------------------------------------------
# Deterministic demo
# ----------------------------------------------------------------------------
if __name__ == "__main__":
    key = jax.random.PRNGKey(0)
    k_adj, k_x, k_w = jax.random.split(key, 3)

    # Small graph: N nodes, F features, H hidden, C classes.
    N, F, H, C = 256, 128, 64, 16

    # Random symmetric binary adjacency (undirected graph, no self loops).
    a = jax.random.bernoulli(k_adj, p=0.05, shape=(N, N)).astype(jnp.float32)
    adj_raw = jnp.clip(a + a.T, 0.0, 1.0)
    adj_raw = adj_raw * (1.0 - jnp.eye(N, dtype=jnp.float32))
    adj = dense_gcn_norm(adj_raw)      # normalized adjacency fed to forward()

    # Node features and surrogate GCN weights [F -> H, H -> C].
    x = jax.random.normal(k_x, (N, F), dtype=jnp.float32)
    weights = make_weights(k_w, (F, H, C))

    fwd_fused = jax.jit(metattack_forward)
    fwd_streamed = jax.jit(functools.partial(metattack_forward,
                                             force_streamed=True))

    out_fused = jax.block_until_ready(fwd_fused(adj, x, weights))
    out_streamed = jax.block_until_ready(fwd_streamed(adj, x, weights))
    assert out_fused.shape == (N, C) and out_streamed.shape == (N, C)

    # Reference mirroring the kernels' bf16 quantization (f32 accumulation).
    def bf(v):
        return v.astype(jnp.bfloat16).astype(jnp.float32)

    adj_q = bf(adj)
    h_ref = x
    for i, w in enumerate(weights):
        t = bf(jnp.dot(h_ref, w, preferred_element_type=jnp.float32))
        h_ref = jnp.dot(adj_q, t, preferred_element_type=jnp.float32)
        if i < len(weights) - 1:
            h_ref = bf(jnp.maximum(h_ref, 0.0))
    ref_q = h_ref

    assert jnp.allclose(out_fused, ref_q, atol=2e-2, rtol=2e-2), "fused != quantized ref"
    assert jnp.allclose(out_streamed, ref_q, atol=2e-2, rtol=2e-2), "streamed != quantized ref"
    assert jnp.allclose(out_fused, out_streamed, atol=2e-2, rtol=2e-2), "fused != streamed"

    # Loose sanity check against the exact f32 PyTorch semantics.
    h_ref = x
    for w in weights[:-1]:
        h_ref = jnp.maximum(adj @ (h_ref @ w), 0.0)
    ref = adj @ (h_ref @ weights[-1])
    assert jnp.allclose(out_fused, ref, atol=5e-2, rtol=5e-2), "mismatch vs f32 reference"

    print("KERNEL_OK")
</pallas_src>

<mosaic_0001>
module attributes {stable_mosaic.version = 11 : i64} {
  func.func @_fused_forward_kernel(%arg0: memref<256x256xbf16, #tpu.memory_space<vmem>>, %arg1: memref<256x128xbf16, #tpu.memory_space<vmem>>, %arg2: memref<128x128xbf16, #tpu.memory_space<vmem>>, %arg3: memref<256x128xf32, #tpu.memory_space<vmem>>) attributes {dimension_semantics = [], scalar_prefetch = 0 : i64, scratch_operands = 0 : i64, tpu.core_type = #tpu.core_type<tc>} {
    %c0 = arith.constant 0 : index
    %c0_0 = arith.constant 0 : index
    %0 = vector.load %arg0[%c0, %c0_0] : memref<256x256xbf16, #tpu.memory_space<vmem>>, vector<256x256xbf16>
    %c0_1 = arith.constant 0 : index
    %c0_2 = arith.constant 0 : index
    %1 = vector.load %arg1[%c0_1, %c0_2] : memref<256x128xbf16, #tpu.memory_space<vmem>>, vector<256x128xbf16>
    %cst = arith.constant dense<0.000000e+00> : vector<256x128xf32>
    %2 = tpu.matmul %0, %1, %cst {dimension_numbers = #tpu.dot_dimension_numbers<[1], [0], [0], [1], [0, 0, 1, 1], [], []>} : vector<256x256xbf16>, vector<256x128xbf16>, vector<256x128xf32> -> vector<256x128xf32>
    %cst_3 = arith.constant 0.000000e+00 : f32
    %3 = vector.broadcast %cst_3 : f32 to vector<256x128xf32>
    %4 = arith.maximumf %2, %3 : vector<256x128xf32>
    %5 = arith.truncf %4 : vector<256x128xf32> to vector<256x128xbf16>
    %c0_4 = arith.constant 0 : index
    %c0_5 = arith.constant 0 : index
    %6 = vector.load %arg2[%c0_4, %c0_5] : memref<128x128xbf16, #tpu.memory_space<vmem>>, vector<128x128xbf16>
    %cst_6 = arith.constant dense<0.000000e+00> : vector<256x128xf32>
    %7 = tpu.matmul %5, %6, %cst_6 {dimension_numbers = #tpu.dot_dimension_numbers<[1], [0], [0], [1], [0, 0, 1, 1], [], []>} : vector<256x128xbf16>, vector<128x128xbf16>, vector<256x128xf32> -> vector<256x128xf32>
    %8 = arith.truncf %7 : vector<256x128xf32> to vector<256x128xbf16>
    %cst_7 = arith.constant dense<0.000000e+00> : vector<256x128xf32>
    %9 = tpu.matmul %0, %8, %cst_7 {dimension_numbers = #tpu.dot_dimension_numbers<[1], [0], [0], [1], [0, 0, 1, 1], [], []>} : vector<256x256xbf16>, vector<256x128xbf16>, vector<256x128xf32> -> vector<256x128xf32>
    %c0_8 = arith.constant 0 : index
    %c0_9 = arith.constant 0 : index
    %10 = vector.load %arg3[%c0_8, %c0_9] : memref<256x128xf32, #tpu.memory_space<vmem>>, vector<256x128xf32>
    tpu.vector_store %arg3[%c0_8, %c0_9], %9 {strides = array<i32>} : memref<256x128xf32, #tpu.memory_space<vmem>>, vector<256x128xf32>,
    return
  }
}

</mosaic_0001>

<bundles_post_ra>
// kernel: metattack_forward.1
= control target key start
LH: loop header
LB: loop body
LE: loop exit
PB: predicated region body
PF: predicated region fallthrough
CT: control target
= control target key end

     0   :  { %s1834_s1 = inlined_call_operand.vmem [shape: bf16[256,128], index: 1, kind: input, shape index: {}]   ;;  %s1835_s0 = inlined_call_operand.vmem [shape: bf16[256,256], index: 0, kind: input, shape index: {}]   ;;  %s1836_s2 = inlined_call_operand.vmem [shape: bf16[128,128], index: 2, kind: input, shape index: {}]   ;;  %s1837_s3 = inlined_call_operand.vmem [shape: f32[256,128], index: 3, kind: output, shape index: {}]  }
   0x1   :  { %v1350_v0 = vld [vmem:[%s1834_s1 + $0x40] sm:$0xff]   ;;  %v1352_v2 = vld [vmem:[%s1834_s1 + $0x48] sm:$0xff]   ;;  %v1354_v4 = vld [vmem:[%s1834_s1 + $0x50] sm:$0xff]  }
   0x2   :  { %v1351_v1 = vld [vmem:[%s1834_s1] sm:$0xff]   ;;  %1038 = vmatprep.subr.bf16.mxu0 %v1350_v0  ;;  %v1353_v3 = vld [vmem:[%s1834_s1 + $0x8] sm:$0xff]   ;;  %v1355_v5 = vld [vmem:[%s1834_s1 + $0x10] sm:$0xff]  }
   0x3   :  { %1039 = vmatpush3.bf16.msra.mxu0 %v1351_v1  ;;  %v1356_v6 = vld [vmem:[%s1834_s1 + $0x58] sm:$0xff]   ;;  %v1358_v8 = vld [vmem:[%s1834_s1 + $0x60] sm:$0xff]   ;;  %v1360_v10 = vld [vmem:[%s1834_s1 + $0x68] sm:$0xff]  }
   0x4   :  { %1040 = vmatprep.subr.bf16.mxu0 %v1352_v2  ;;  %v1357_v7 = vld [vmem:[%s1834_s1 + $0x18] sm:$0xff]   ;;  %v1359_v9 = vld [vmem:[%s1834_s1 + $0x20] sm:$0xff]   ;;  %v1361_v12 = vld [vmem:[%s1834_s1 + $0x28] sm:$0xff]  }
   0x5   :  { %v1478_v11 = vld [vmem:[%s1835_s0 + $0x4] ss:$8 sps:$4 sm:$0xff]   ;;  %v1362_v13 = vld [vmem:[%s1834_s1 + $0x70] sm:$0xff]   ;;  %v1364_v15 = vld [vmem:[%s1834_s1 + $0x78] sm:$0xff]  }
   0x6   :  { %367 = vmatprep.mubr.bf16.mxu0 %v1478_v11  ;;  %v1363_v14 = vld [vmem:[%s1834_s1 + $0x30] sm:$0xff]   ;;  %v1365_v16 = vld [vmem:[%s1834_s1 + $0x38] sm:$0xff]   ;;  %v1499_v17 = vld [vmem:[%s1835_s0] ss:$8 sps:$4 sm:$0xff]  }
   0x7   :  { %1041 = vmatpush3.bf16.msra.mxu0 %v1353_v3  ;;  %v1504_v18 = vld [vmem:[%s1835_s0 + $0x14] ss:$8 sps:$4 sm:$0xff]   ;;  %v1511_v19 = vld [vmem:[%s1835_s0 + $0x10] ss:$8 sps:$4 sm:$0xff]   ;;  %v1516_v20 = vld [vmem:[%s1835_s0 + $0x24] ss:$8 sps:$4 sm:$0xff]  }
   0x8   :  { %1042 = vmatprep.subr.bf16.mxu0 %v1354_v4  ;;  %v1414_v21 = vld [vmem:[%s1836_s2] sm:$0xff]   ;;  %v1415_v22 = vld [vmem:[%s1836_s2 + $0x8] sm:$0xff]   ;;  %v1416_v23 = vld [vmem:[%s1836_s2 + $0x10] sm:$0xff]  }
   0x9   :  { %1334 = vmatprep.subr.bf16.mxu1 %v1414_v21  ;;  %v1532_v24 = vld [vmem:[%s1835_s0 + $0x20] ss:$8 sps:$4 sm:$0xff]   ;;  %v1417_v25 = vld [vmem:[%s1836_s2 + $0x18] sm:$0xff]   ;;  %v1552_v28 = vld [vmem:[%s1835_s0 + $0x44] ss:$8 sps:$4 sm:$0xff]  }
   0xa   :  { %1342 = vmatpush3.bf16.msra.mxu1 %v1414_v21  ;;  %v1540_v26 = vld [vmem:[%s1835_s0 + $0x34] ss:$8 sps:$4 sm:$0xff]   ;;  %v1547_v27 = vld [vmem:[%s1835_s0 + $0x30] ss:$8 sps:$4 sm:$0xff]   ;;  %v1559_v29 = vld [vmem:[%s1835_s0 + $0x40] ss:$8 sps:$4 sm:$0xff]  }
   0xb   :  { %1043 = vmatpush3.bf16.msra.mxu0 %v1355_v5  ;;  %1335 = vmatprep.subr.bf16.mxu1 %v1415_v22  ;;  %v1564_v30 = vld [vmem:[%s1835_s0 + $0x54] ss:$8 sps:$4 sm:$0xff]   ;;  %v1571_v31 = vld [vmem:[%s1835_s0 + $0x50] ss:$8 sps:$4 sm:$0xff]   ;;  %v1576_v32 = vld [vmem:[%s1835_s0 + $0x64] ss:$8 sps:$4 sm:$0xff]  }
   0xc   :  { %1044 = vmatprep.subr.bf16.mxu0 %v1356_v6  ;;  %v1583_v33 = vld [vmem:[%s1835_s0 + $0x60] ss:$8 sps:$4 sm:$0xff]   ;;  %v1588_v34 = vld [vmem:[%s1835_s0 + $0x74] ss:$8 sps:$4 sm:$0xff]   ;;  %v1595_v35 = vld [vmem:[%s1835_s0 + $0x70] ss:$8 sps:$4 sm:$0xff]  }
   0xd   :  { %v1600_v36 = vld [vmem:[%s1835_s0 + $0x84] ss:$8 sps:$4 sm:$0xff]   ;;  %v1607_v37 = vld [vmem:[%s1835_s0 + $0x80] ss:$8 sps:$4 sm:$0xff]   ;;  %v1612_v38 = vld [vmem:[%s1835_s0 + $0x94] ss:$8 sps:$4 sm:$0xff]  }
   0xe   :  { %1343 = vmatpush3.bf16.msra.mxu1 %v1415_v22  ;;  %v1619_v39 = vld [vmem:[%s1835_s0 + $0x90] ss:$8 sps:$4 sm:$0xff]   ;;  %v1624_v40 = vld [vmem:[%s1835_s0 + $0xa4] ss:$8 sps:$4 sm:$0xff]   ;;  %v1631_v41 = vld [vmem:[%s1835_s0 + $0xa0] ss:$8 sps:$4 sm:$0xff]  }
   0xf   :  { %1045 = vmatpush3.bf16.msra.mxu0 %v1357_v7  ;;  %1336 = vmatprep.subr.bf16.mxu1 %v1416_v23  ;;  %v1636_v42 = vld [vmem:[%s1835_s0 + $0xb4] ss:$8 sps:$4 sm:$0xff]   ;;  %v1418_v43 = vld [vmem:[%s1836_s2 + $0x20] sm:$0xff]   ;;  %v1646_v44 = vld [vmem:[%s1835_s0 + $0xb0] ss:$8 sps:$4 sm:$0xff]  }
  0x10   :  { %1046 = vmatprep.subr.bf16.mxu0 %v1358_v8  ;;  %v1651_v45 = vld [vmem:[%s1835_s0 + $0xc4] ss:$8 sps:$4 sm:$0xff]   ;;  %v1420_v47 = vld [vmem:[%s1836_s2 + $0x30] sm:$0xff]   ;;  %v1664_v48 = vld [vmem:[%s1835_s0 + $0xc0] ss:$8 sps:$4 sm:$0xff]  }
  0x11   :  { %v1419_v46 = vld [vmem:[%s1836_s2 + $0x28] sm:$0xff]   ;;  %v1669_v49 = vld [vmem:[%s1835_s0 + $0xd4] ss:$8 sps:$4 sm:$0xff]   ;;  %v1679_v51 = vld [vmem:[%s1835_s0 + $0xd0] ss:$8 sps:$4 sm:$0xff]  }
  0x12   :  { %1344 = vmatpush3.bf16.msra.mxu1 %v1416_v23  ;;  %v1421_v50 = vld [vmem:[%s1836_s2 + $0x38] sm:$0xff]   ;;  %v1684_v52 = vld [vmem:[%s1835_s0 + $0xe4] ss:$8 sps:$4 sm:$0xff]   ;;  %v1691_v53 = vld [vmem:[%s1835_s0 + $0xe0] ss:$8 sps:$4 sm:$0xff]  }
  0x13   :  { %1047 = vmatpush3.bf16.msra.mxu0 %v1359_v9  ;;  %1337 = vmatprep.subr.bf16.mxu1 %v1417_v25  ;;  %v1696_v54 = vld [vmem:[%s1835_s0 + $0xf4] ss:$8 sps:$4 sm:$0xff]   ;;  %v1703_v55 = vld [vmem:[%s1835_s0 + $0xf0] ss:$8 sps:$4 sm:$0xff]  }
  0x14   :  { %1048 = vmatprep.subr.bf16.mxu0 %v1360_v10 }
  0x16   :  { %1345 = vmatpush3.bf16.msra.mxu1 %v1417_v25 }
  0x17   :  { %1049 = vmatpush3.bf16.msra.mxu0 %v1361_v12  ;;  %1338 = vmatprep.subr.bf16.mxu1 %v1418_v43 }
  0x18   :  { %1050 = vmatprep.subr.bf16.mxu0 %v1362_v13 }
  0x1a   :  { %1346 = vmatpush3.bf16.msra.mxu1 %v1418_v43 }
  0x1b   :  { %1051 = vmatpush3.bf16.msra.mxu0 %v1363_v14  ;;  %1339 = vmatprep.subr.bf16.mxu1 %v1419_v46 }
  0x1c   :  { %1052 = vmatprep.subr.bf16.mxu0 %v1364_v15 }
  0x1e   :  { %1347 = vmatpush3.bf16.msra.mxu1 %v1419_v46 }
  0x1f   :  { %1053 = vmatpush3.bf16.msra.mxu0 %v1365_v16  ;;  %1340 = vmatprep.subr.bf16.mxu1 %v1420_v47 }
  0x20   :  { %1286 = vmatprep.subr.bf16.mxu0 %v1414_v21 }
  0x22   :  { %368 = vmatmul.mubr.bf16.vlgmr.msra.gmra.mrb[0].mxu0 %v1499_v17  ;;  %1348 = vmatpush3.bf16.msra.mxu1 %v1420_v47 }
  0x23   :  { %375 = vmatprep.mubr.bf16.mxu0 %v1504_v18  ;;  %1287 = vmatpush3.bf16.msra.mxu0 %v1414_v21 }
  0x24   :  { %1288 = vmatprep.subr.bf16.mxu0 %v1415_v22  ;;  %1341 = vmatprep.subr.bf16.mxu1 %v1421_v50 }
  0x26   :  { %1349 = vmatpush3.bf16.msra.mxu1 %v1421_v50 }
  0x27   :  { %1289 = vmatpush3.bf16.msra.mxu0 %v1415_v22 }
  0x28   :  { %1290 = vmatprep.subr.bf16.mxu0 %v1416_v23 }
  0x2a   :  { %376 = vmatmul.mubr.bf16.gmra.mrb[4].mxu0 %v1511_v19 }
  0x2b   :  { %383 = vmatprep.mubr.bf16.mxu0 %v1516_v20  ;;  %1291 = vmatpush3.bf16.msra.mxu0 %v1416_v23 }
  0x2c   :  { %1292 = vmatprep.subr.bf16.mxu0 %v1417_v25 }
  0x2f   :  { %1293 = vmatpush3.bf16.msra.mxu0 %v1417_v25 }
  0x30   :  { %1294 = vmatprep.subr.bf16.mxu0 %v1418_v43 }
  0x32   :  { %384 = vmatmul.mubr.bf16.gmra.mrb[8].mxu0 %v1532_v24 }
  0x33   :  { %391 = vmatprep.mubr.bf16.mxu0 %v1540_v26  ;;  %1295 = vmatpush3.bf16.msra.mxu0 %v1418_v43 }
  0x34   :  { %1296 = vmatprep.subr.bf16.mxu0 %v1419_v46 }
  0x37   :  { %1297 = vmatpush3.bf16.msra.mxu0 %v1419_v46 }
  0x38   :  { %1298 = vmatprep.subr.bf16.mxu0 %v1420_v47 }
  0x3a   :  { %392 = vmatmul.mubr.bf16.gmra.mrb[12].mxu0 %v1547_v27 }
  0x3b   :  { %399 = vmatprep.mubr.bf16.mxu0 %v1552_v28  ;;  %1299 = vmatpush3.bf16.msra.mxu0 %v1420_v47 }
  0x3c   :  { %1300 = vmatprep.subr.bf16.mxu0 %v1421_v50 }
  0x3f   :  { %1301 = vmatpush3.bf16.msra.mxu0 %v1421_v50 }
  0x42   :  { %400 = vmatmul.mubr.bf16.gmra.mrb[16].mxu0 %v1559_v29 }
  0x43   :  { %407 = vmatprep.mubr.bf16.mxu0 %v1564_v30 }
  0x4a   :  { %408 = vmatmul.mubr.bf16.gmra.mrb[20].mxu0 %v1571_v31 }
  0x4b   :  { %415 = vmatprep.mubr.bf16.mxu0 %v1576_v32 }
  0x52   :  { %416 = vmatmul.mubr.bf16.gmra.mrb[24].mxu0 %v1583_v33 }
  0x53   :  { %423 = vmatprep.mubr.bf16.mxu0 %v1588_v34 }
  0x5a   :  { %424 = vmatmul.mubr.bf16.gmra.mrb[28].mxu0 %v1595_v35 }
  0x5b   :  { %431 = vmatprep.mubr.bf16.mxu0 %v1600_v36 }
  0x62   :  { %432 = vmatmul.mubr.bf16.gmra.mrb[32].mxu0 %v1607_v37 }
  0x63   :  { %439 = vmatprep.mubr.bf16.mxu0 %v1612_v38 }
  0x6a   :  { %440 = vmatmul.mubr.bf16.gmra.mrb[36].mxu0 %v1619_v39 }
  0x6b   :  { %447 = vmatprep.mubr.bf16.mxu0 %v1624_v40 }
  0x72   :  { %448 = vmatmul.mubr.bf16.gmra.mrb[40].mxu0 %v1631_v41 }
  0x73   :  { %455 = vmatprep.mubr.bf16.mxu0 %v1636_v42 }
  0x7a   :  { %456 = vmatmul.mubr.bf16.gmra.mrb[44].mxu0 %v1646_v44 }
  0x7b   :  { %463 = vmatprep.mubr.bf16.mxu0 %v1651_v45 }
  0x82   :  { %464 = vmatmul.mubr.bf16.gmra.mrb[48].mxu0 %v1664_v48 }
  0x83   :  { %471 = vmatprep.mubr.bf16.mxu0 %v1669_v49 }
  0x8a   :  { %472 = vmatmul.mubr.bf16.gmra.mrb[52].mxu0 %v1679_v51 }
  0x8b   :  { %479 = vmatprep.mubr.bf16.mxu0 %v1684_v52 }
  0x92   :  { %480 = vmatmul.mubr.bf16.gmra.mrb[56].mxu0 %v1691_v53 }
  0x93   :  { %487 = vmatprep.mubr.bf16.mxu0 %v1696_v54 }
  0x9a   :  { %488 = vmatmul.mubr.bf16.gmra.mrb[60].mxu0 %v1703_v55 }
  0xf5   :  { %v1054_v56 = vpop.f32.mrb[0].mxu0 }
  0xf6   :  { %v1055_v57 = vpop.f32.mrb[1].mxu0 }
  0xf7   :  { %v1056_v58 = vadd.f32 %v1055_v57, %v1054_v56  ;;  %v1057_v59 = vpop.f32.mrb[2].mxu0 }
  0xf8   :  { %v1058_v60 = vpop.f32.mrb[3].mxu0 }
  0xf9   :  { %v1059_v61 = vadd.f32 %v1058_v60, %v1057_v59  ;;  %v496_v62 = vmax.f32 %v1056_v58, 0.0 }
  0xfb   :  { %v497_v63 = vmax.f32 %v1059_v61, 0.0 }
  0xfd   :  { %v528_v0 = vpack.c.bf16 %v497_v63, %v496_v62  ;;  %v1060_v1 = vpop.f32.mrb[4].mxu0 }
  0xfe   :  { %v1061_v2 = vpop.f32.mrb[5].mxu0 }
  0xff   :  { %v1062_v3 = vadd.f32 %v1061_v2, %v1060_v1  ;;  %v1063_v4 = vpop.f32.mrb[6].mxu0  ;;  %1302 = vmatprep.mubr.bf16.mxu0 %v528_v0 }
 0x100   :  { %v1064_v5 = vpop.f32.mrb[7].mxu0 }
 0x101   :  { %v1065_v6 = vadd.f32 %v1064_v5, %v1063_v4  ;;  %v498_v7 = vmax.f32 %v1062_v3, 0.0 }
 0x103   :  { %v499_v8 = vmax.f32 %v1065_v6, 0.0 }
 0x105   :  { %v529_v9 = vpack.c.bf16 %v499_v8, %v498_v7  ;;  %v1066_v10 = vpop.f32.mrb[8].mxu0 }
 0x106   :  { %v1067_v12 = vpop.f32.mrb[9].mxu0 }
 0x107   :  { %v1068_v13 = vadd.f32 %v1067_v12, %v1066_v10  ;;  %v1069_v14 = vpop.f32.mrb[10].mxu0  ;;  %1303 = vmatmul.mubr.bf16.vlgmr.msra.gmra.mrb[64].mxu0 %v529_v9 }
 0x108   :  { %v1070_v15 = vpop.f32.mrb[11].mxu0 }
 0x109   :  { %v1071_v16 = vadd.f32 %v1070_v15, %v1069_v14  ;;  %v500_v21 = vmax.f32 %v1068_v13, 0.0 }
 0x10b   :  { %v501_v22 = vmax.f32 %v1071_v16, 0.0 }
 0x10d   :  { %v530_v23 = vpack.c.bf16 %v501_v22, %v500_v21  ;;  %v1072_v25 = vpop.f32.mrb[12].mxu0 }
 0x10e   :  { %v1073_v43 = vpop.f32.mrb[13].mxu0 }
 0x10f   :  { %v1074_v46 = vadd.f32 %v1073_v43, %v1072_v25  ;;  %v1075_v47 = vpop.f32.mrb[14].mxu0  ;;  %1306 = vmatprep.mubr.bf16.mxu0 %v530_v23 }
 0x110   :  { %v1076_v50 = vpop.f32.mrb[15].mxu0 }
 0x111   :  { %v1077_v56 = vadd.f32 %v1076_v50, %v1075_v47  ;;  %v502_v57 = vmax.f32 %v1074_v46, 0.0 }
 0x113   :  { %v503_v58 = vmax.f32 %v1077_v56, 0.0 }
 0x115   :  { %v531_v59 = vpack.c.bf16 %v503_v58, %v502_v57  ;;  %v1078_v60 = vpop.f32.mrb[16].mxu0 }
 0x116   :  { %v1079_v61 = vpop.f32.mrb[17].mxu0 }
 0x117   :  { %v1080_v62 = vadd.f32 %v1079_v61, %v1078_v60  ;;  %v1081_v63 = vpop.f32.mrb[18].mxu0  ;;  %1307 = vmatmul.mubr.bf16.gmra.mrb[68].mxu0 %v531_v59 }
 0x118   :  { %v1082_v0 = vpop.f32.mrb[19].mxu0 }
 0x119   :  { %v1083_v1 = vadd.f32 %v1082_v0, %v1081_v63  ;;  %v504_v2 = vmax.f32 %v1080_v62, 0.0 }
 0x11b   :  { %v505_v3 = vmax.f32 %v1083_v1, 0.0 }
 0x11d   :  { %v532_v4 = vpack.c.bf16 %v505_v3, %v504_v2  ;;  %v1084_v5 = vpop.f32.mrb[20].mxu0 }
 0x11e   :  { %v1085_v6 = vpop.f32.mrb[21].mxu0 }
 0x11f   :  { %v1086_v7 = vadd.f32 %v1085_v6, %v1084_v5  ;;  %v1087_v8 = vpop.f32.mrb[22].mxu0  ;;  %1310 = vmatprep.mubr.bf16.mxu0 %v532_v4 }
 0x120   :  { %v1088_v9 = vpop.f32.mrb[23].mxu0 }
 0x121   :  { %v1089_v10 = vadd.f32 %v1088_v9, %v1087_v8  ;;  %v506_v12 = vmax.f32 %v1086_v7, 0.0 }
 0x123   :  { %v507_v13 = vmax.f32 %v1089_v10, 0.0 }
 0x125   :  { %v533_v14 = vpack.c.bf16 %v507_v13, %v506_v12  ;;  %v1090_v15 = vpop.f32.mrb[24].mxu0 }
 0x126   :  { %v1091_v16 = vpop.f32.mrb[25].mxu0 }
 0x127   :  { %v1092_v21 = vadd.f32 %v1091_v16, %v1090_v15  ;;  %v1093_v22 = vpop.f32.mrb[26].mxu0  ;;  %1311 = vmatmul.mubr.bf16.gmra.mrb[72].mxu0 %v533_v14 }
 0x128   :  { %v1094_v23 = vpop.f32.mrb[27].mxu0 }
 0x129   :  { %v1095_v25 = vadd.f32 %v1094_v23, %v1093_v22  ;;  %v508_v43 = vmax.f32 %v1092_v21, 0.0 }
 0x12b   :  { %v509_v46 = vmax.f32 %v1095_v25, 0.0 }
 0x12d   :  { %v534_v47 = vpack.c.bf16 %v509_v46, %v508_v43  ;;  %v1096_v50 = vpop.f32.mrb[28].mxu0 }
 0x12e   :  { %v1097_v56 = vpop.f32.mrb[29].mxu0 }
 0x12f   :  { %v1098_v57 = vadd.f32 %v1097_v56, %v1096_v50  ;;  %v1099_v58 = vpop.f32.mrb[30].mxu0  ;;  %1314 = vmatprep.mubr.bf16.mxu0 %v534_v47 }
 0x130   :  { %v1100_v59 = vpop.f32.mrb[31].mxu0 }
 0x131   :  { %v1101_v60 = vadd.f32 %v1100_v59, %v1099_v58  ;;  %v510_v61 = vmax.f32 %v1098_v57, 0.0 }
 0x133   :  { %v511_v62 = vmax.f32 %v1101_v60, 0.0 }
 0x135   :  { %v535_v63 = vpack.c.bf16 %v511_v62, %v510_v61  ;;  %v1102_v0 = vpop.f32.mrb[32].mxu0 }
 0x136   :  { %v1103_v1 = vpop.f32.mrb[33].mxu0 }
 0x137   :  { %v1104_v2 = vadd.f32 %v1103_v1, %v1102_v0  ;;  %v1105_v3 = vpop.f32.mrb[34].mxu0  ;;  %1315 = vmatmul.mubr.bf16.gmra.mrb[76].mxu0 %v535_v63 }
 0x138   :  { %v1106_v4 = vpop.f32.mrb[35].mxu0 }
 0x139   :  { %v1107_v5 = vadd.f32 %v1106_v4, %v1105_v3  ;;  %v512_v6 = vmax.f32 %v1104_v2, 0.0 }
 0x13b   :  { %v513_v7 = vmax.f32 %v1107_v5, 0.0 }
 0x13d   :  { %v1108_v8 = vpop.f32.mrb[36].mxu0  ;;  %v536_v9 = vpack.c.bf16 %v513_v7, %v512_v6 }
 0x13e   :  { %v1109_v10 = vpop.f32.mrb[37].mxu0 }
 0x13f   :  { %v1110_v12 = vadd.f32 %v1109_v10, %v1108_v8  ;;  %v1111_v13 = vpop.f32.mrb[38].mxu0  ;;  %1318 = vmatprep.mubr.bf16.mxu1 %v536_v9 }
 0x140   :  { %v1112_v14 = vpop.f32.mrb[39].mxu0 }
 0x141   :  { %v1113_v15 = vadd.f32 %v1112_v14, %v1111_v13  ;;  %v514_v16 = vmax.f32 %v1110_v12, 0.0 }
 0x143   :  { %v515_v21 = vmax.f32 %v1113_v15, 0.0 }
 0x145   :  { %v537_v22 = vpack.c.bf16 %v515_v21, %v514_v16  ;;  %v1114_v23 = vpop.f32.mrb[40].mxu0 }
 0x146   :  { %v1115_v25 = vpop.f32.mrb[41].mxu0 }
 0x147   :  { %v1116_v43 = vadd.f32 %v1115_v25, %v1114_v23  ;;  %v1117_v46 = vpop.f32.mrb[42].mxu0  ;;  %1319 = vmatmul.mubr.bf16.vlgmr.msra.gmra.mrb[0].mxu1 %v537_v22 }
 0x148   :  { %v1118_v47 = vpop.f32.mrb[43].mxu0 }
 0x149   :  { %v1119_v50 = vadd.f32 %v1118_v47, %v1117_v46  ;;  %v516_v56 = vmax.f32 %v1116_v43, 0.0 }
 0x14b   :  { %v517_v57 = vmax.f32 %v1119_v50, 0.0 }
 0x14d   :  { %v538_v58 = vpack.c.bf16 %v517_v57, %v516_v56  ;;  %v1120_v59 = vpop.f32.mrb[44].mxu0 }
 0x14e   :  { %v1121_v60 = vpop.f32.mrb[45].mxu0 }
 0x14f   :  { %v1122_v61 = vadd.f32 %v1121_v60, %v1120_v59  ;;  %v1123_v62 = vpop.f32.mrb[46].mxu0  ;;  %1322 = vmatprep.mubr.bf16.mxu1 %v538_v58 }
 0x150   :  { %v1124_v63 = vpop.f32.mrb[47].mxu0 }
 0x151   :  { %v1125_v0 = vadd.f32 %v1124_v63, %v1123_v62  ;;  %v518_v1 = vmax.f32 %v1122_v61, 0.0 }
 0x153   :  { %v519_v2 = vmax.f32 %v1125_v0, 0.0 }
 0x155   :  { %v539_v3 = vpack.c.bf16 %v519_v2, %v518_v1  ;;  %v1126_v4 = vpop.f32.mrb[48].mxu0 }
 0x156   :  { %v1127_v5 = vpop.f32.mrb[49].mxu0 }
 0x157   :  { %v1128_v6 = vadd.f32 %v1127_v5, %v1126_v4  ;;  %v1129_v7 = vpop.f32.mrb[50].mxu0  ;;  %1323 = vmatmul.mubr.bf16.gmra.mrb[4].mxu1 %v539_v3 }
 0x158   :  { %v1130_v8 = vpop.f32.mrb[51].mxu0 }
 0x159   :  { %v1131_v9 = vadd.f32 %v1130_v8, %v1129_v7  ;;  %v520_v10 = vmax.f32 %v1128_v6, 0.0 }
 0x15b   :  { %v521_v12 = vmax.f32 %v1131_v9, 0.0 }
 0x15d   :  { %v540_v13 = vpack.c.bf16 %v521_v12, %v520_v10  ;;  %v1132_v14 = vpop.f32.mrb[52].mxu0 }
 0x15e   :  { %v1133_v15 = vpop.f32.mrb[53].mxu0 }
 0x15f   :  { %v1134_v16 = vadd.f32 %v1133_v15, %v1132_v14  ;;  %v1135_v21 = vpop.f32.mrb[54].mxu0  ;;  %1326 = vmatprep.mubr.bf16.mxu1 %v540_v13 }
 0x160   :  { %v1136_v22 = vpop.f32.mrb[55].mxu0 }
 0x161   :  { %v1137_v23 = vadd.f32 %v1136_v22, %v1135_v21  ;;  %v522_v25 = vmax.f32 %v1134_v16, 0.0 }
 0x163   :  { %v523_v43 = vmax.f32 %v1137_v23, 0.0 }
 0x165   :  { %v541_v46 = vpack.c.bf16 %v523_v43, %v522_v25  ;;  %v1138_v47 = vpop.f32.mrb[56].mxu0 }
 0x166   :  { %v1139_v50 = vpop.f32.mrb[57].mxu0 }
 0x167   :  { %v1140_v56 = vadd.f32 %v1139_v50, %v1138_v47  ;;  %v1141_v57 = vpop.f32.mrb[58].mxu0  ;;  %1327 = vmatmul.mubr.bf16.gmra.mrb[8].mxu1 %v541_v46 }
 0x168   :  { %v1142_v58 = vpop.f32.mrb[59].mxu0 }
 0x169   :  { %v1143_v59 = vadd.f32 %v1142_v58, %v1141_v57  ;;  %v524_v60 = vmax.f32 %v1140_v56, 0.0 }
 0x16b   :  { %v525_v61 = vmax.f32 %v1143_v59, 0.0 }
 0x16d   :  { %v542_v62 = vpack.c.bf16 %v525_v61, %v524_v60  ;;  %v1144_v63 = vpop.f32.mrb[60].mxu0 }
 0x16e   :  { %v1145_v0 = vpop.f32.mrb[61].mxu0 }
 0x16f   :  { %v1146_v1 = vadd.f32 %v1145_v0, %v1144_v63  ;;  %v1147_v2 = vpop.f32.mrb[62].mxu0  ;;  %1330 = vmatprep.mubr.bf16.mxu1 %v542_v62 }
 0x170   :  { %v1148_v3 = vpop.f32.mrb[63].mxu0 }
 0x171   :  { %v1149_v4 = vadd.f32 %v1148_v3, %v1147_v2  ;;  %v526_v5 = vmax.f32 %v1146_v1, 0.0 }
 0x173   :  { %v527_v6 = vmax.f32 %v1149_v4, 0.0 }
 0x175   :  { %v543_v7 = vpack.c.bf16 %v527_v6, %v526_v5 }
 0x177   :  { %1331 = vmatmul.mubr.bf16.gmra.mrb[12].mxu1 %v543_v7 }
 0x178   :  { %817 = vmatprep.mubr.bf16.mxu1 %v1478_v11 }
 0x1da   :  { %v1304_v8 = vpop.f32.mrb[64].mxu0 }
 0x1db   :  { %v642_v9 = vpop.f32.mrb[65].mxu0 }
 0x1dc   :  { %v1305_v10 = vpop.f32.mrb[66].mxu0 }
 0x1dd   :  { %v770_v12 = vpack.c.bf16 %v1305_v10, %v1304_v8  ;;  %v645_v13 = vpop.f32.mrb[67].mxu0 }
 0x1de   :  { %v769_v14 = vpack.c.bf16 %v645_v13, %v642_v9 }
 0x1ea   :  { %v1308_v15 = vpop.f32.mrb[68].mxu0 }
 0x1eb   :  { %v658_v16 = vpop.f32.mrb[69].mxu0 }
 0x1ec   :  { %v1309_v21 = vpop.f32.mrb[70].mxu0 }
 0x1ed   :  { %v772_v22 = vpack.c.bf16 %v1309_v21, %v1308_v15  ;;  %v661_v23 = vpop.f32.mrb[71].mxu0 }
 0x1ee   :  { %v771_v25 = vpack.c.bf16 %v661_v23, %v658_v16 }
 0x1fa   :  { %v1312_v43 = vpop.f32.mrb[72].mxu0 }
 0x1fb   :  { %v674_v46 = vpop.f32.mrb[73].mxu0 }
 0x1fc   :  { %v1313_v47 = vpop.f32.mrb[74].mxu0 }
 0x1fd   :  { %v774_v50 = vpack.c.bf16 %v1313_v47, %v1312_v43  ;;  %v677_v56 = vpop.f32.mrb[75].mxu0 }
 0x1fe   :  { %v773_v57 = vpack.c.bf16 %v677_v56, %v674_v46 }
 0x20a   :  { %v1316_v58 = vpop.f32.mrb[76].mxu0 }
 0x20b   :  { %v690_v11 = vpop.f32.mrb[77].mxu0 }
 0x20c   :  { %v1317_v59 = vpop.f32.mrb[78].mxu0 }
 0x20d   :  { %v776_v60 = vpack.c.bf16 %v1317_v59, %v1316_v58  ;;  %v693_v61 = vpop.f32.mrb[79].mxu0 }
 0x20e   :  { %v775_v62 = vpack.c.bf16 %v693_v61, %v690_v11 }
 0x21a   :  { %v1320_v63 = vpop.f32.mrb[0].mxu1 }
 0x21b   :  { %v706_v0 = vpop.f32.mrb[1].mxu1 }
 0x21c   :  { %v1321_v1 = vpop.f32.mrb[2].mxu1 }
 0x21d   :  { %v778_v2 = vpack.c.bf16 %v1321_v1, %v1320_v63  ;;  %v709_v3 = vpop.f32.mrb[3].mxu1 }
 0x21e   :  { %v777_v4 = vpack.c.bf16 %v709_v3, %v706_v0 }
 0x220   :  { %1174 = vmatprep.subr.bf16.mxu1 %v777_v4 }
 0x221   :  { %1175 = vmatpush3.bf16.msra.mxu1 %v769_v14 }
 0x222   :  { %1176 = vmatprep.subr.bf16.mxu1 %v778_v2 }
 0x225   :  { %1177 = vmatpush3.bf16.msra.mxu1 %v770_v12 }
 0x22a   :  { %v1324_v5 = vpop.f32.mrb[4].mxu1 }
 0x22b   :  { %v722_v6 = vpop.f32.mrb[5].mxu1 }
 0x22c   :  { %v1325_v7 = vpop.f32.mrb[6].mxu1 }
 0x22d   :  { %v780_v8 = vpack.c.bf16 %v1325_v7, %v1324_v5  ;;  %v725_v9 = vpop.f32.mrb[7].mxu1 }
 0x22e   :  { %v779_v10 = vpack.c.bf16 %v725_v9, %v722_v6 }
 0x230   :  { %1178 = vmatprep.subr.bf16.mxu1 %v779_v10 }
 0x231   :  { %1179 = vmatpush3.bf16.msra.mxu1 %v771_v25 }
 0x232   :  { %1180 = vmatprep.subr.bf16.mxu1 %v780_v8 }
 0x235   :  { %1181 = vmatpush3.bf16.msra.mxu1 %v772_v22 }
 0x23a   :  { %v1328_v13 = vpop.f32.mrb[8].mxu1 }
 0x23b   :  { %v738_v15 = vpop.f32.mrb[9].mxu1 }
 0x23c   :  { %v1329_v16 = vpop.f32.mrb[10].mxu1 }
 0x23d   :  { %v782_v21 = vpack.c.bf16 %v1329_v16, %v1328_v13  ;;  %v741_v23 = vpop.f32.mrb[11].mxu1 }
 0x23e   :  { %v781_v43 = vpack.c.bf16 %v741_v23, %v738_v15 }
 0x240   :  { %1182 = vmatprep.subr.bf16.mxu1 %v781_v43 }
 0x241   :  { %1183 = vmatpush3.bf16.msra.mxu1 %v773_v57 }
 0x242   :  { %1184 = vmatprep.subr.bf16.mxu1 %v782_v21 }
 0x245   :  { %1185 = vmatpush3.bf16.msra.mxu1 %v774_v50 }
 0x24a   :  { %v1332_v12 = vpop.f32.mrb[12].mxu1 }
 0x24b   :  { %v754_v14 = vpop.f32.mrb[13].mxu1 }
 0x24c   :  { %v1333_v46 = vpop.f32.mrb[14].mxu1 }
 0x24d   :  { %v784_v47 = vpack.c.bf16 %v1333_v46, %v1332_v12  ;;  %v757_v56 = vpop.f32.mrb[15].mxu1 }
 0x24e   :  { %v783_v58 = vpack.c.bf16 %v757_v56, %v754_v14 }
 0x250   :  { %1186 = vmatprep.subr.bf16.mxu1 %v783_v58 }
 0x251   :  { %1187 = vmatpush3.bf16.msra.mxu1 %v775_v62 }
 0x252   :  { %1188 = vmatprep.subr.bf16.mxu1 %v784_v47 }
 0x255   :  { %1189 = vmatpush3.bf16.msra.mxu1 %v776_v60 }
 0x258   :  { %818 = vmatmul.mubr.bf16.vlgmr.msra.gmra.mrb[16].mxu1 %v1499_v17 }
 0x259   :  { %825 = vmatprep.mubr.bf16.mxu1 %v1504_v18 }
 0x260   :  { %826 = vmatmul.mubr.bf16.gmra.mrb[20].mxu1 %v1511_v19 }
 0x261   :  { %833 = vmatprep.mubr.bf16.mxu1 %v1516_v20 }
 0x268   :  { %834 = vmatmul.mubr.bf16.gmra.mrb[24].mxu1 %v1532_v24 }
 0x269   :  { %841 = vmatprep.mubr.bf16.mxu1 %v1540_v26 }
 0x270   :  { %842 = vmatmul.mubr.bf16.gmra.mrb[28].mxu1 %v1547_v27 }
 0x271   :  { %849 = vmatprep.mubr.bf16.mxu1 %v1552_v28 }
 0x278   :  { %850 = vmatmul.mubr.bf16.gmra.mrb[32].mxu1 %v1559_v29 }
 0x279   :  { %857 = vmatprep.mubr.bf16.mxu1 %v1564_v30 }
 0x280   :  { %858 = vmatmul.mubr.bf16.gmra.mrb[36].mxu1 %v1571_v31 }
 0x281   :  { %865 = vmatprep.mubr.bf16.mxu1 %v1576_v32 }
 0x288   :  { %866 = vmatmul.mubr.bf16.gmra.mrb[40].mxu1 %v1583_v33 }
 0x289   :  { %873 = vmatprep.mubr.bf16.mxu1 %v1588_v34 }
 0x290   :  { %874 = vmatmul.mubr.bf16.gmra.mrb[44].mxu1 %v1595_v35 }
 0x291   :  { %881 = vmatprep.mubr.bf16.mxu1 %v1600_v36 }
 0x298   :  { %882 = vmatmul.mubr.bf16.gmra.mrb[48].mxu1 %v1607_v37 }
 0x299   :  { %889 = vmatprep.mubr.bf16.mxu1 %v1612_v38 }
 0x2a0   :  { %890 = vmatmul.mubr.bf16.gmra.mrb[52].mxu1 %v1619_v39 }
 0x2a1   :  { %897 = vmatprep.mubr.bf16.mxu1 %v1624_v40 }
 0x2a8   :  { %898 = vmatmul.mubr.bf16.gmra.mrb[56].mxu1 %v1631_v41 }
 0x2a9   :  { %905 = vmatprep.mubr.bf16.mxu1 %v1636_v42 }
 0x2b0   :  { %906 = vmatmul.mubr.bf16.gmra.mrb[60].mxu1 %v1646_v44 }
 0x2b1   :  { %913 = vmatprep.mubr.bf16.mxu1 %v1651_v45 }
 0x2b8   :  { %914 = vmatmul.mubr.bf16.gmra.mrb[64].mxu1 %v1664_v48 }
 0x2b9   :  { %921 = vmatprep.mubr.bf16.mxu1 %v1669_v49 }
 0x2c0   :  { %922 = vmatmul.mubr.bf16.gmra.mrb[68].mxu1 %v1679_v51 }
 0x2c1   :  { %929 = vmatprep.mubr.bf16.mxu1 %v1684_v52 }
 0x2c8   :  { %930 = vmatmul.mubr.bf16.gmra.mrb[72].mxu1 %v1691_v53 }
 0x2c9   :  { %937 = vmatprep.mubr.bf16.mxu1 %v1696_v54 }
 0x2d0   :  { %938 = vmatmul.mubr.bf16.gmra.mrb[76].mxu1 %v1703_v55 }
 0x32b   :  { %v1190_v17 = vpop.f32.mrb[16].mxu1 }
 0x32c   :  { %v1191_v18 = vpop.f32.mrb[17].mxu1 }
 0x32d   :  { %v1192_v19 = vadd.f32 %v1191_v18, %v1190_v17  ;;  %v1193_v20 = vpop.f32.mrb[18].mxu1 }
 0x32e   :  { %v1194_v24 = vpop.f32.mrb[19].mxu1 }
 0x32f   :  { %946 = vst [vmem:[%s1837_s3] sm:$0xff] %v1192_v19  ;;  %v1195_v26 = vadd.f32 %v1194_v24, %v1193_v20 }
 0x331   :  { %947 = vst [vmem:[%s1837_s3 + $0x8] sm:$0xff] %v1195_v26 }
 0x333   :  { %v1196_v27 = vpop.f32.mrb[20].mxu1 }
 0x334   :  { %v1197_v28 = vpop.f32.mrb[21].mxu1 }
 0x335   :  { %v1198_v29 = vadd.f32 %v1197_v28, %v1196_v27  ;;  %v1199_v30 = vpop.f32.mrb[22].mxu1 }
 0x336   :  { %v1200_v31 = vpop.f32.mrb[23].mxu1 }
 0x337   :  { %948 = vst [vmem:[%s1837_s3 + $0x10] sm:$0xff] %v1198_v29  ;;  %v1201_v32 = vadd.f32 %v1200_v31, %v1199_v30 }
 0x339   :  { %949 = vst [vmem:[%s1837_s3 + $0x18] sm:$0xff] %v1201_v32 }
 0x33b   :  { %v1202_v33 = vpop.f32.mrb[24].mxu1 }
 0x33c   :  { %v1203_v34 = vpop.f32.mrb[25].mxu1 }
 0x33d   :  { %v1204_v35 = vadd.f32 %v1203_v34, %v1202_v33  ;;  %v1205_v36 = vpop.f32.mrb[26].mxu1 }
 0x33e   :  { %v1206_v37 = vpop.f32.mrb[27].mxu1 }
 0x33f   :  { %950 = vst [vmem:[%s1837_s3 + $0x20] sm:$0xff] %v1204_v35  ;;  %v1207_v38 = vadd.f32 %v1206_v37, %v1205_v36 }
 0x341   :  { %951 = vst [vmem:[%s1837_s3 + $0x28] sm:$0xff] %v1207_v38 }
 0x343   :  { %v1208_v39 = vpop.f32.mrb[28].mxu1 }
 0x344   :  { %v1209_v40 = vpop.f32.mrb[29].mxu1 }
 0x345   :  { %v1210_v41 = vadd.f32 %v1209_v40, %v1208_v39  ;;  %v1211_v42 = vpop.f32.mrb[30].mxu1 }
 0x346   :  { %v1212_v44 = vpop.f32.mrb[31].mxu1 }
 0x347   :  { %952 = vst [vmem:[%s1837_s3 + $0x30] sm:$0xff] %v1210_v41  ;;  %v1213_v45 = vadd.f32 %v1212_v44, %v1211_v42 }
 0x349   :  { %953 = vst [vmem:[%s1837_s3 + $0x38] sm:$0xff] %v1213_v45 }
 0x34b   :  { %v1214_v48 = vpop.f32.mrb[32].mxu1 }
 0x34c   :  { %v1215_v49 = vpop.f32.mrb[33].mxu1 }
 0x34d   :  { %v1216_v51 = vadd.f32 %v1215_v49, %v1214_v48  ;;  %v1217_v52 = vpop.f32.mrb[34].mxu1 }
 0x34e   :  { %v1218_v53 = vpop.f32.mrb[35].mxu1 }
 0x34f   :  { %954 = vst [vmem:[%s1837_s3 + $0x40] sm:$0xff] %v1216_v51  ;;  %v1219_v54 = vadd.f32 %v1218_v53, %v1217_v52 }
 0x351   :  { %955 = vst [vmem:[%s1837_s3 + $0x48] sm:$0xff] %v1219_v54 }
 0x353   :  { %v1220_v55 = vpop.f32.mrb[36].mxu1 }
 0x354   :  { %v1221_v22 = vpop.f32.mrb[37].mxu1 }
 0x355   :  { %v1222_v25 = vadd.f32 %v1221_v22, %v1220_v55  ;;  %v1223_v50 = vpop.f32.mrb[38].mxu1 }
 0x356   :  { %v1224_v57 = vpop.f32.mrb[39].mxu1 }
 0x357   :  { %956 = vst [vmem:[%s1837_s3 + $0x50] sm:$0xff] %v1222_v25  ;;  %v1225_v11 = vadd.f32 %v1224_v57, %v1223_v50 }
 0x359   :  { %957 = vst [vmem:[%s1837_s3 + $0x58] sm:$0xff] %v1225_v11 }
 0x35b   :  { %v1226_v59 = vpop.f32.mrb[40].mxu1 }
 0x35c   :  { %v1227_v60 = vpop.f32.mrb[41].mxu1 }
 0x35d   :  { %v1228_v61 = vadd.f32 %v1227_v60, %v1226_v59  ;;  %v1229_v62 = vpop.f32.mrb[42].mxu1 }
 0x35e   :  { %v1230_v63 = vpop.f32.mrb[43].mxu1 }
 0x35f   :  { %958 = vst [vmem:[%s1837_s3 + $0x60] sm:$0xff] %v1228_v61  ;;  %v1231_v0 = vadd.f32 %v1230_v63, %v1229_v62 }
 0x361   :  { %959 = vst [vmem:[%s1837_s3 + $0x68] sm:$0xff] %v1231_v0 }
 0x363   :  { %v1232_v1 = vpop.f32.mrb[44].mxu1 }
 0x364   :  { %v1233_v2 = vpop.f32.mrb[45].mxu1 }
 0x365   :  { %v1234_v3 = vadd.f32 %v1233_v2, %v1232_v1  ;;  %v1235_v4 = vpop.f32.mrb[46].mxu1 }
 0x366   :  { %v1236_v5 = vpop.f32.mrb[47].mxu1 }
 0x367   :  { %960 = vst [vmem:[%s1837_s3 + $0x70] sm:$0xff] %v1234_v3  ;;  %v1237_v6 = vadd.f32 %v1236_v5, %v1235_v4 }
 0x369   :  { %961 = vst [vmem:[%s1837_s3 + $0x78] sm:$0xff] %v1237_v6 }
 0x36b   :  { %v1238_v7 = vpop.f32.mrb[48].mxu1 }
 0x36c   :  { %v1239_v8 = vpop.f32.mrb[49].mxu1 }
 0x36d   :  { %v1240_v9 = vadd.f32 %v1239_v8, %v1238_v7  ;;  %v1241_v10 = vpop.f32.mrb[50].mxu1 }
 0x36e   :  { %v1242_v13 = vpop.f32.mrb[51].mxu1 }
 0x36f   :  { %962 = vst [vmem:[%s1837_s3 + $0x80] sm:$0xff] %v1240_v9  ;;  %v1243_v15 = vadd.f32 %v1242_v13, %v1241_v10 }
 0x371   :  { %963 = vst [vmem:[%s1837_s3 + $0x88] sm:$0xff] %v1243_v15 }
 0x373   :  { %v1244_v16 = vpop.f32.mrb[52].mxu1 }
 0x374   :  { %v1245_v21 = vpop.f32.mrb[53].mxu1 }
 0x375   :  { %v1246_v23 = vadd.f32 %v1245_v21, %v1244_v16  ;;  %v1247_v43 = vpop.f32.mrb[54].mxu1 }
 0x376   :  { %v1248_v12 = vpop.f32.mrb[55].mxu1 }
 0x377   :  { %964 = vst [vmem:[%s1837_s3 + $0x90] sm:$0xff] %v1246_v23  ;;  %v1249_v14 = vadd.f32 %v1248_v12, %v1247_v43 }
 0x379   :  { %965 = vst [vmem:[%s1837_s3 + $0x98] sm:$0xff] %v1249_v14 }
 0x37b   :  { %v1250_v46 = vpop.f32.mrb[56].mxu1 }
 0x37c   :  { %v1251_v47 = vpop.f32.mrb[57].mxu1 }
 0x37d   :  { %v1252_v56 = vadd.f32 %v1251_v47, %v1250_v46  ;;  %v1253_v58 = vpop.f32.mrb[58].mxu1 }
 0x37e   :  { %v1254_v17 = vpop.f32.mrb[59].mxu1 }
 0x37f   :  { %966 = vst [vmem:[%s1837_s3 + $0xa0] sm:$0xff] %v1252_v56  ;;  %v1255_v18 = vadd.f32 %v1254_v17, %v1253_v58 }
 0x381   :  { %967 = vst [vmem:[%s1837_s3 + $0xa8] sm:$0xff] %v1255_v18 }
 0x383   :  { %v1256_v19 = vpop.f32.mrb[60].mxu1 }
 0x384   :  { %v1257_v20 = vpop.f32.mrb[61].mxu1 }
 0x385   :  { %v1258_v24 = vadd.f32 %v1257_v20, %v1256_v19  ;;  %v1259_v26 = vpop.f32.mrb[62].mxu1 }
 0x386   :  { %v1260_v27 = vpop.f32.mrb[63].mxu1 }
 0x387   :  { %968 = vst [vmem:[%s1837_s3 + $0xb0] sm:$0xff] %v1258_v24  ;;  %v1261_v28 = vadd.f32 %v1260_v27, %v1259_v26 }
 0x389   :  { %969 = vst [vmem:[%s1837_s3 + $0xb8] sm:$0xff] %v1261_v28 }
 0x38b   :  { %v1262_v29 = vpop.f32.mrb[64].mxu1 }
 0x38c   :  { %v1263_v30 = vpop.f32.mrb[65].mxu1 }
 0x38d   :  { %v1264_v31 = vadd.f32 %v1263_v30, %v1262_v29  ;;  %v1265_v32 = vpop.f32.mrb[66].mxu1 }
 0x38e   :  { %v1266_v33 = vpop.f32.mrb[67].mxu1 }
 0x38f   :  { %970 = vst [vmem:[%s1837_s3 + $0xc0] sm:$0xff] %v1264_v31  ;;  %v1267_v34 = vadd.f32 %v1266_v33, %v1265_v32 }
 0x391   :  { %971 = vst [vmem:[%s1837_s3 + $0xc8] sm:$0xff] %v1267_v34 }
 0x393   :  { %v1268_v35 = vpop.f32.mrb[68].mxu1 }
 0x394   :  { %v1269_v36 = vpop.f32.mrb[69].mxu1 }
 0x395   :  { %v1270_v37 = vadd.f32 %v1269_v36, %v1268_v35  ;;  %v1271_v38 = vpop.f32.mrb[70].mxu1 }
 0x396   :  { %v1272_v39 = vpop.f32.mrb[71].mxu1 }
 0x397   :  { %972 = vst [vmem:[%s1837_s3 + $0xd0] sm:$0xff] %v1270_v37  ;;  %v1273_v40 = vadd.f32 %v1272_v39, %v1271_v38 }
 0x399   :  { %973 = vst [vmem:[%s1837_s3 + $0xd8] sm:$0xff] %v1273_v40 }
 0x39b   :  { %v1274_v41 = vpop.f32.mrb[72].mxu1 }
 0x39c   :  { %v1275_v42 = vpop.f32.mrb[73].mxu1 }
 0x39d   :  { %v1276_v44 = vadd.f32 %v1275_v42, %v1274_v41  ;;  %v1277_v45 = vpop.f32.mrb[74].mxu1 }
 0x39e   :  { %v1278_v48 = vpop.f32.mrb[75].mxu1 }
 0x39f   :  { %974 = vst [vmem:[%s1837_s3 + $0xe0] sm:$0xff] %v1276_v44  ;;  %v1279_v49 = vadd.f32 %v1278_v48, %v1277_v45 }
 0x3a1   :  { %975 = vst [vmem:[%s1837_s3 + $0xe8] sm:$0xff] %v1279_v49 }
 0x3a3   :  { %v1280_v51 = vpop.f32.mrb[76].mxu1 }
 0x3a4   :  { %v1281_v52 = vpop.f32.mrb[77].mxu1 }
 0x3a5   :  { %v1282_v53 = vadd.f32 %v1281_v52, %v1280_v51  ;;  %v1283_v54 = vpop.f32.mrb[78].mxu1 }
 0x3a6   :  { %v1284_v55 = vpop.f32.mrb[79].mxu1 }
 0x3a7   :  { %976 = vst [vmem:[%s1837_s3 + $0xf0] sm:$0xff] %v1282_v53  ;;  %v1285_v22 = vadd.f32 %v1284_v55, %v1283_v54 }
 0x3a9   :  { %977 = vst [vmem:[%s1837_s3 + $0xf8] sm:$0xff] %v1285_v22 }

</bundles_post_ra>
